<compile_context>
chip_gen: v5e
topology: v5e:2x2
jax: 0.10.0
libtpu: 0.0.40
codegen_flags: <defaults>
</compile_context>

<pallas_src>
import functools

import jax
import jax.numpy as jnp
import numpy as np
from jax import lax
from jax.experimental import pallas as pl
from jax.experimental.pallas import tpu as pltpu


def _basic_block_kernel(x_ref, w1_ref, b1_ref, w2_ref, b2_ref, mask_ref,
                        out_ref, col_ref, *, width):
    """Fused conv3x3 -> BN1 -> ReLU -> conv3x3 -> BN2 -> +residual -> ReLU.

    Layout: channels on sublanes, flattened (n, h, w) spatial on lanes.
      x_ref    : (C, M)      M = N*H*W (lane-dense)
      w*_ref   : (P, 9*C)    im2col weights, BN scale pre-folded into rows
      b*_ref   : (P, 1)      folded BN bias
      mask_ref : (9, 1, M)   0/1 halo masks implementing zero padding
      out_ref  : (P, M)
      col_ref  : (9*C, M)    shared im2col scratch (tile-aligned tap slabs)
    """
    x = x_ref[...]             # (C, M)
    masks = mask_ref[...]      # (9, 1, M)

    def shift_lanes(v, d):
        # t[:, m] = v[:, m + d]; lanes with no source are filled with 0
        # (they are zeroed by the halo mask anyway).  d is a static Python int,
        # so all slices below are static.
        if d == 0:
            return v
        c, m = v.shape
        fill = jnp.zeros((c, abs(d)), v.dtype)
        if d > 0:
            return jnp.concatenate([v[:, d:], fill], axis=1)
        return jnp.concatenate([fill, v[:, :m + d]], axis=1)

    def conv3x3(v, w_ref_):
        # Build the im2col RHS (9*C, M) in the shared VMEM scratch: tap k lives
        # on sublane rows [k*C, (k+1)*C) -- tile-aligned for C=8, no lane concat.
        cin = v.shape[0]
        for k in range(9):
            dh, dw = k // 3 - 1, k % 3 - 1
            tap = shift_lanes(v, dh * width + dw) * masks[k]      # (cin, M)
            col_ref[k * cin:(k + 1) * cin, :] = tap
        # One MXU contraction per conv: (P, 9*C) x (9*C, M) -> (P, M).
        return jnp.dot(w_ref_[...], col_ref[...],
                       preferred_element_type=jnp.float32)

    # conv1 -> (scale-folded) BN1 bias -> ReLU
    h = jnp.maximum(conv3x3(x, w1_ref) + b1_ref[...], 0.0)        # (P, M)
    # conv2 -> BN2 bias -> +residual -> ReLU   (stride=1, no downsample, C == P)
    o = conv3x3(h, w2_ref) + b2_ref[...]
    out_ref[...] = jnp.maximum(o + x, 0.0)


def basic_block_forward(x_nchw, params, eps=1e-5):
    """Pallas-backed BasicBlock forward. Input/output are NCHW like PyTorch."""
    (w1, g1, be1, m1, v1, w2, g2, be2, m2, v2) = params

    N, C, H, W = x_nchw.shape
    P = w1.shape[0]
    assert w1.shape[1] == C and w2.shape[1] == P and C == P, (
        "stride=1 / downsample=None BasicBlock requires inplanes == planes")
    M = N * H * W

    # Fold BN running stats into per-channel scale/bias (eval-mode BN), then fold
    # the scale into the conv weights (conv is linear in its weights).
    s1 = g1 / jnp.sqrt(v1 + eps)
    b1 = be1 - m1 * s1
    s2 = g2 / jnp.sqrt(v2 + eps)
    b2 = be2 - m2 * s2

    # OIHW -> (O, kh, kw, I) -> (O, 9*I); column order (kh, kw, cin) matches the
    # kernel's tap order k = kh*3 + kw.  BN scale folded into output-channel rows.
    w1col = (jnp.transpose(w1, (0, 2, 3, 1)).reshape(P, 9 * C)
             * s1[:, None]).astype(jnp.float32)
    w2col = (jnp.transpose(w2, (0, 2, 3, 1)).reshape(P, 9 * P)
             * s2[:, None]).astype(jnp.float32)

    # NCHW -> (C, N*H*W): channels on sublanes, flattened spatial on lanes.
    x_flat = jnp.transpose(x_nchw, (1, 0, 2, 3)).reshape(C, M).astype(jnp.float32)

    # Precomputed halo masks (pure geometry, built with numpy at trace time):
    # mask[k, 0, n*H*W + h*W + w] = 1 iff (h+dh, w+dw) is inside the image for tap
    # k = (dh+1)*3 + (dw+1).  This replaces both in-kernel padded scratches.
    hh = np.arange(H)[:, None]
    ww = np.arange(W)[None, :]
    masks_np = np.zeros((9, 1, M), np.float32)
    for k in range(9):
        dh, dw = k // 3 - 1, k % 3 - 1
        valid = ((hh + dh >= 0) & (hh + dh < H) &
                 (ww + dw >= 0) & (ww + dw < W))
        masks_np[k, 0] = np.tile(valid.reshape(-1), N).astype(np.float32)
    masks = jnp.asarray(masks_np)

    flops = 2 * (2 * M * (9 * C) * P)                       # two conv matmuls
    bytes_accessed = 4 * (C * M + P * 9 * C + P * 9 * P + 2 * P + 9 * M + P * M)

    grid_spec = pltpu.PrefetchScalarGridSpec(
        num_scalar_prefetch=0,
        grid=(1,),                                          # single step: whole
        in_specs=[                                          # problem fits VMEM
            pl.BlockSpec((C, M), lambda i: (0, 0)),         # x (lane-dense)
            pl.BlockSpec((P, 9 * C), lambda i: (0, 0)),     # w1 (scale-folded)
            pl.BlockSpec((P, 1), lambda i: (0, 0)),         # b1
            pl.BlockSpec((P, 9 * P), lambda i: (0, 0)),     # w2 (scale-folded)
            pl.BlockSpec((P, 1), lambda i: (0, 0)),         # b2
            pl.BlockSpec((9, 1, M), lambda i: (0, 0, 0)),   # halo masks
        ],
        out_specs=pl.BlockSpec((P, M), lambda i: (0, 0)),   # lane-dense output
        scratch_shapes=[pltpu.VMEM((9 * C, M), jnp.float32)],   # shared col
    )

    out_flat = pl.pallas_call(
        functools.partial(_basic_block_kernel, width=W),
        out_shape=jax.ShapeDtypeStruct((P, M), jnp.float32),
        grid_spec=grid_spec,
        compiler_params=pltpu.CompilerParams(
            dimension_semantics=("arbitrary",)),
        cost_estimate=pl.CostEstimate(
            flops=flops, transcendentals=0, bytes_accessed=bytes_accessed),
    )(x_flat, w1col, b1.reshape(P, 1).astype(jnp.float32),
      w2col, b2.reshape(P, 1).astype(jnp.float32), masks)

    # (C, N*H*W) -> NCHW
    return jnp.transpose(out_flat.reshape(P, N, H, W), (1, 0, 2, 3))


def _reference_forward(x_nchw, params, eps=1e-5):
    """Pure-JAX reference matching the PyTorch (eval-mode) forward."""
    (w1, g1, be1, m1, v1, w2, g2, be2, m2, v2) = params

    def conv(x, w):
        return lax.conv_general_dilated(
            x, w, window_strides=(1, 1), padding=((1, 1), (1, 1)),
            dimension_numbers=("NCHW", "OIHW", "NCHW"))

    def bn(x, g, b, m, v):
        sh = (1, -1, 1, 1)
        return (x - m.reshape(sh)) / jnp.sqrt(v.reshape(sh) + eps) \
            * g.reshape(sh) + b.reshape(sh)

    out = jax.nn.relu(bn(conv(x_nchw, w1), g1, be1, m1, v1))
    out = bn(conv(out, w2), g2, be2, m2, v2)
    return jax.nn.relu(out + x_nchw)


def _make_params(key, inplanes, planes):
    """Deterministic parameter init matching the module's shapes."""
    ks = jax.random.split(key, 8)
    w1 = 0.1 * jax.random.normal(ks[0], (planes, inplanes, 3, 3), jnp.float32)
    w2 = 0.1 * jax.random.normal(ks[1], (planes, planes, 3, 3), jnp.float32)
    g1 = 1.0 + 0.1 * jax.random.normal(ks[2], (planes,), jnp.float32)
    be1 = 0.1 * jax.random.normal(ks[3], (planes,), jnp.float32)
    m1 = 0.1 * jax.random.normal(ks[4], (planes,), jnp.float32)
    v1 = 1.0 + 0.1 * jax.random.uniform(ks[5], (planes,), jnp.float32)
    g2 = 1.0 + 0.1 * jax.random.normal(ks[6], (planes,), jnp.float32)
    be2 = 0.1 * jax.random.normal(ks[7], (planes,), jnp.float32)
    m2 = jnp.zeros((planes,), jnp.float32)
    v2 = jnp.ones((planes,), jnp.float32)
    return (w1, g1, be1, m1, v1, w2, g2, be2, m2, v2)


if __name__ == "__main__":
    key = jax.random.PRNGKey(0)
    k_x, k_p = jax.random.split(key)

    # BasicBlock(inplanes=8, planes=8, stride=1, downsample=None)
    inplanes = planes = 8
    N, H, W = 2, 16, 16
    x = jax.random.normal(k_x, (N, inplanes, H, W), jnp.float32)   # NCHW
    params = _make_params(k_p, inplanes, planes)

    out = jax.block_until_ready(basic_block_forward(x, params))

    ref = jax.block_until_ready(_reference_forward(x, params))
    np.testing.assert_allclose(np.asarray(out), np.asarray(ref),
                               rtol=1e-4, atol=1e-4)

    print("KERNEL_OK")
</pallas_src>

<mosaic_0001>
module attributes {stable_mosaic.version = 11 : i64} {
  func.func @_basic_block_kernel(%arg0: i32, %arg1: memref<8x512xf32, #tpu.memory_space<vmem>>, %arg2: memref<8x72xf32, #tpu.memory_space<vmem>>, %arg3: memref<8x1xf32, #tpu.memory_space<vmem>>, %arg4: memref<8x72xf32, #tpu.memory_space<vmem>>, %arg5: memref<8x1xf32, #tpu.memory_space<vmem>>, %arg6: memref<9x1x512xf32, #tpu.memory_space<vmem>>, %arg7: memref<8x512xf32, #tpu.memory_space<vmem>>, %arg8: memref<72x512xf32, #tpu.memory_space<vmem>>) attributes {dimension_semantics = [#tpu.dimension_semantics<arbitrary>], iteration_bounds = array<i64: 1>, scalar_prefetch = 0 : i64, scratch_operands = 1 : i64, tpu.core_type = #tpu.core_type<tc>, window_params = [{pipeline_mode = #tpu.pipeline_mode<synchronous>, transform_indices = @transform_0, window_bounds = array<i64: 8, 512>}, {pipeline_mode = #tpu.pipeline_mode<synchronous>, transform_indices = @transform_1, window_bounds = array<i64: 8, 72>}, {pipeline_mode = #tpu.pipeline_mode<synchronous>, transform_indices = @transform_2, window_bounds = array<i64: 8, 1>}, {pipeline_mode = #tpu.pipeline_mode<synchronous>, transform_indices = @transform_3, window_bounds = array<i64: 8, 72>}, {pipeline_mode = #tpu.pipeline_mode<synchronous>, transform_indices = @transform_4, window_bounds = array<i64: 8, 1>}, {pipeline_mode = #tpu.pipeline_mode<synchronous>, transform_indices = @transform_5, window_bounds = array<i64: 9, 1, 512>}, {pipeline_mode = #tpu.pipeline_mode<synchronous>, transform_indices = @transform_6, window_bounds = array<i64: 8, 512>}]} {
    %c0 = arith.constant 0 : index
    %c0_0 = arith.constant 0 : index
    %0 = vector.load %arg1[%c0, %c0_0] : memref<8x512xf32, #tpu.memory_space<vmem>>, vector<8x512xf32>
    %c0_1 = arith.constant 0 : index
    %c0_2 = arith.constant 0 : index
    %c0_3 = arith.constant 0 : index
    %1 = vector.load %arg6[%c0_1, %c0_2, %c0_3] : memref<9x1x512xf32, #tpu.memory_space<vmem>>, vector<9x1x512xf32>
    %cst = arith.constant 0.000000e+00 : f32
    %2 = vector.broadcast %cst : f32 to vector<8x17xf32>
    %3 = vector.extract_strided_slice %0 {offsets = [0, 0], sizes = [8, 495], strides = [1, 1]} : vector<8x512xf32> to vector<8x495xf32>
    %4 = tpu.concatenate %2, %3 in 1 : vector<8x17xf32>, vector<8x495xf32> -> vector<8x512xf32>
    %5 = vector.extract_strided_slice %1 {offsets = [0, 0, 0], sizes = [1, 1, 512], strides = [1, 1, 1]} : vector<9x1x512xf32> to vector<1x1x512xf32>
    %6 = vector.shape_cast %5 : vector<1x1x512xf32> to vector<1x512xf32>
    %7 = vector.broadcast %6 : vector<1x512xf32> to vector<8x512xf32>
    %8 = arith.mulf %4, %7 : vector<8x512xf32>
    %c0_4 = arith.constant 0 : index
    %c0_5 = arith.constant 0 : index
    %9 = vector.load %arg8[%c0_4, %c0_5] : memref<72x512xf32, #tpu.memory_space<vmem>>, vector<8x512xf32>
    tpu.vector_store %arg8[%c0_4, %c0_5], %8 {strides = array<i32>} : memref<72x512xf32, #tpu.memory_space<vmem>>, vector<8x512xf32>,
    %cst_6 = arith.constant 0.000000e+00 : f32
    %10 = vector.broadcast %cst_6 : f32 to vector<8x16xf32>
    %11 = vector.extract_strided_slice %0 {offsets = [0, 0], sizes = [8, 496], strides = [1, 1]} : vector<8x512xf32> to vector<8x496xf32>
    %12 = tpu.concatenate %10, %11 in 1 : vector<8x16xf32>, vector<8x496xf32> -> vector<8x512xf32>
    %13 = vector.extract_strided_slice %1 {offsets = [1, 0, 0], sizes = [1, 1, 512], strides = [1, 1, 1]} : vector<9x1x512xf32> to vector<1x1x512xf32>
    %14 = vector.shape_cast %13 : vector<1x1x512xf32> to vector<1x512xf32>
    %15 = vector.broadcast %14 : vector<1x512xf32> to vector<8x512xf32>
    %16 = arith.mulf %12, %15 : vector<8x512xf32>
    %c8 = arith.constant 8 : index
    %c0_7 = arith.constant 0 : index
    %17 = vector.load %arg8[%c8, %c0_7] : memref<72x512xf32, #tpu.memory_space<vmem>>, vector<8x512xf32>
    tpu.vector_store %arg8[%c8, %c0_7], %16 {strides = array<i32>} : memref<72x512xf32, #tpu.memory_space<vmem>>, vector<8x512xf32>,
    %cst_8 = arith.constant 0.000000e+00 : f32
    %18 = vector.broadcast %cst_8 : f32 to vector<8x15xf32>
    %19 = vector.extract_strided_slice %0 {offsets = [0, 0], sizes = [8, 497], strides = [1, 1]} : vector<8x512xf32> to vector<8x497xf32>
    %20 = tpu.concatenate %18, %19 in 1 : vector<8x15xf32>, vector<8x497xf32> -> vector<8x512xf32>
    %21 = vector.extract_strided_slice %1 {offsets = [2, 0, 0], sizes = [1, 1, 512], strides = [1, 1, 1]} : vector<9x1x512xf32> to vector<1x1x512xf32>
    %22 = vector.shape_cast %21 : vector<1x1x512xf32> to vector<1x512xf32>
    %23 = vector.broadcast %22 : vector<1x512xf32> to vector<8x512xf32>
    %24 = arith.mulf %20, %23 : vector<8x512xf32>
    %c16 = arith.constant 16 : index
    %c0_9 = arith.constant 0 : index
    %25 = vector.load %arg8[%c16, %c0_9] : memref<72x512xf32, #tpu.memory_space<vmem>>, vector<8x512xf32>
    tpu.vector_store %arg8[%c16, %c0_9], %24 {strides = array<i32>} : memref<72x512xf32, #tpu.memory_space<vmem>>, vector<8x512xf32>,
    %cst_10 = arith.constant 0.000000e+00 : f32
    %26 = vector.broadcast %cst_10 : f32 to vector<8x1xf32>
    %27 = vector.extract_strided_slice %0 {offsets = [0, 0], sizes = [8, 511], strides = [1, 1]} : vector<8x512xf32> to vector<8x511xf32>
    %28 = tpu.concatenate %26, %27 in 1 : vector<8x1xf32>, vector<8x511xf32> -> vector<8x512xf32>
    %29 = vector.extract_strided_slice %1 {offsets = [3, 0, 0], sizes = [1, 1, 512], strides = [1, 1, 1]} : vector<9x1x512xf32> to vector<1x1x512xf32>
    %30 = vector.shape_cast %29 : vector<1x1x512xf32> to vector<1x512xf32>
    %31 = vector.broadcast %30 : vector<1x512xf32> to vector<8x512xf32>
    %32 = arith.mulf %28, %31 : vector<8x512xf32>
    %c24 = arith.constant 24 : index
    %c0_11 = arith.constant 0 : index
    %33 = vector.load %arg8[%c24, %c0_11] : memref<72x512xf32, #tpu.memory_space<vmem>>, vector<8x512xf32>
    tpu.vector_store %arg8[%c24, %c0_11], %32 {strides = array<i32>} : memref<72x512xf32, #tpu.memory_space<vmem>>, vector<8x512xf32>,
    %34 = vector.extract_strided_slice %1 {offsets = [4, 0, 0], sizes = [1, 1, 512], strides = [1, 1, 1]} : vector<9x1x512xf32> to vector<1x1x512xf32>
    %35 = vector.shape_cast %34 : vector<1x1x512xf32> to vector<1x512xf32>
    %36 = vector.broadcast %35 : vector<1x512xf32> to vector<8x512xf32>
    %37 = arith.mulf %0, %36 : vector<8x512xf32>
    %c32 = arith.constant 32 : index
    %c0_12 = arith.constant 0 : index
    %38 = vector.load %arg8[%c32, %c0_12] : memref<72x512xf32, #tpu.memory_space<vmem>>, vector<8x512xf32>
    tpu.vector_store %arg8[%c32, %c0_12], %37 {strides = array<i32>} : memref<72x512xf32, #tpu.memory_space<vmem>>, vector<8x512xf32>,
    %cst_13 = arith.constant 0.000000e+00 : f32
    %39 = vector.broadcast %cst_13 : f32 to vector<8x1xf32>
    %40 = vector.extract_strided_slice %0 {offsets = [0, 1], sizes = [8, 511], strides = [1, 1]} : vector<8x512xf32> to vector<8x511xf32>
    %41 = tpu.concatenate %40, %39 in 1 : vector<8x511xf32>, vector<8x1xf32> -> vector<8x512xf32>
    %42 = vector.extract_strided_slice %1 {offsets = [5, 0, 0], sizes = [1, 1, 512], strides = [1, 1, 1]} : vector<9x1x512xf32> to vector<1x1x512xf32>
    %43 = vector.shape_cast %42 : vector<1x1x512xf32> to vector<1x512xf32>
    %44 = vector.broadcast %43 : vector<1x512xf32> to vector<8x512xf32>
    %45 = arith.mulf %41, %44 : vector<8x512xf32>
    %c40 = arith.constant 40 : index
    %c0_14 = arith.constant 0 : index
    %46 = vector.load %arg8[%c40, %c0_14] : memref<72x512xf32, #tpu.memory_space<vmem>>, vector<8x512xf32>
    tpu.vector_store %arg8[%c40, %c0_14], %45 {strides = array<i32>} : memref<72x512xf32, #tpu.memory_space<vmem>>, vector<8x512xf32>,
    %cst_15 = arith.constant 0.000000e+00 : f32
    %47 = vector.broadcast %cst_15 : f32 to vector<8x15xf32>
    %48 = vector.extract_strided_slice %0 {offsets = [0, 15], sizes = [8, 497], strides = [1, 1]} : vector<8x512xf32> to vector<8x497xf32>
    %49 = tpu.concatenate %48, %47 in 1 : vector<8x497xf32>, vector<8x15xf32> -> vector<8x512xf32>
    %50 = vector.extract_strided_slice %1 {offsets = [6, 0, 0], sizes = [1, 1, 512], strides = [1, 1, 1]} : vector<9x1x512xf32> to vector<1x1x512xf32>
    %51 = vector.shape_cast %50 : vector<1x1x512xf32> to vector<1x512xf32>
    %52 = vector.broadcast %51 : vector<1x512xf32> to vector<8x512xf32>
    %53 = arith.mulf %49, %52 : vector<8x512xf32>
    %c48 = arith.constant 48 : index
    %c0_16 = arith.constant 0 : index
    %54 = vector.load %arg8[%c48, %c0_16] : memref<72x512xf32, #tpu.memory_space<vmem>>, vector<8x512xf32>
    tpu.vector_store %arg8[%c48, %c0_16], %53 {strides = array<i32>} : memref<72x512xf32, #tpu.memory_space<vmem>>, vector<8x512xf32>,
    %cst_17 = arith.constant 0.000000e+00 : f32
    %55 = vector.broadcast %cst_17 : f32 to vector<8x16xf32>
    %56 = vector.extract_strided_slice %0 {offsets = [0, 16], sizes = [8, 496], strides = [1, 1]} : vector<8x512xf32> to vector<8x496xf32>
    %57 = tpu.concatenate %56, %55 in 1 : vector<8x496xf32>, vector<8x16xf32> -> vector<8x512xf32>
    %58 = vector.extract_strided_slice %1 {offsets = [7, 0, 0], sizes = [1, 1, 512], strides = [1, 1, 1]} : vector<9x1x512xf32> to vector<1x1x512xf32>
    %59 = vector.shape_cast %58 : vector<1x1x512xf32> to vector<1x512xf32>
    %60 = vector.broadcast %59 : vector<1x512xf32> to vector<8x512xf32>
    %61 = arith.mulf %57, %60 : vector<8x512xf32>
    %c56 = arith.constant 56 : index
    %c0_18 = arith.constant 0 : index
    %62 = vector.load %arg8[%c56, %c0_18] : memref<72x512xf32, #tpu.memory_space<vmem>>, vector<8x512xf32>
    tpu.vector_store %arg8[%c56, %c0_18], %61 {strides = array<i32>} : memref<72x512xf32, #tpu.memory_space<vmem>>, vector<8x512xf32>,
    %cst_19 = arith.constant 0.000000e+00 : f32
    %63 = vector.broadcast %cst_19 : f32 to vector<8x17xf32>
    %64 = vector.extract_strided_slice %0 {offsets = [0, 17], sizes = [8, 495], strides = [1, 1]} : vector<8x512xf32> to vector<8x495xf32>
    %65 = tpu.concatenate %64, %63 in 1 : vector<8x495xf32>, vector<8x17xf32> -> vector<8x512xf32>
    %66 = vector.extract_strided_slice %1 {offsets = [8, 0, 0], sizes = [1, 1, 512], strides = [1, 1, 1]} : vector<9x1x512xf32> to vector<1x1x512xf32>
    %67 = vector.shape_cast %66 : vector<1x1x512xf32> to vector<1x512xf32>
    %68 = vector.broadcast %67 : vector<1x512xf32> to vector<8x512xf32>
    %69 = arith.mulf %65, %68 : vector<8x512xf32>
    %c64 = arith.constant 64 : index
    %c0_20 = arith.constant 0 : index
    %70 = vector.load %arg8[%c64, %c0_20] : memref<72x512xf32, #tpu.memory_space<vmem>>, vector<8x512xf32>
    tpu.vector_store %arg8[%c64, %c0_20], %69 {strides = array<i32>} : memref<72x512xf32, #tpu.memory_space<vmem>>, vector<8x512xf32>,
    %c0_21 = arith.constant 0 : index
    %c0_22 = arith.constant 0 : index
    %71 = vector.load %arg2[%c0_21, %c0_22] : memref<8x72xf32, #tpu.memory_space<vmem>>, vector<8x72xf32>
    %c0_23 = arith.constant 0 : index
    %c0_24 = arith.constant 0 : index
    %72 = vector.load %arg8[%c0_23, %c0_24] : memref<72x512xf32, #tpu.memory_space<vmem>>, vector<72x512xf32>
    %cst_25 = arith.constant dense<0.000000e+00> : vector<8x512xf32>
    %73 = tpu.matmul %71, %72, %cst_25 {dimension_numbers = #tpu.dot_dimension_numbers<[1], [0], [0], [1], [0, 0, 1, 1], [], []>} : vector<8x72xf32>, vector<72x512xf32>, vector<8x512xf32> -> vector<8x512xf32>
    %c0_26 = arith.constant 0 : index
    %c0_27 = arith.constant 0 : index
    %74 = vector.load %arg3[%c0_26, %c0_27] : memref<8x1xf32, #tpu.memory_space<vmem>>, vector<8x1xf32>
    %75 = vector.broadcast %74 : vector<8x1xf32> to vector<8x512xf32>
    %76 = arith.addf %73, %75 : vector<8x512xf32>
    %cst_28 = arith.constant 0.000000e+00 : f32
    %77 = vector.broadcast %cst_28 : f32 to vector<8x512xf32>
    %78 = arith.maximumf %76, %77 : vector<8x512xf32>
    %cst_29 = arith.constant 0.000000e+00 : f32
    %79 = vector.broadcast %cst_29 : f32 to vector<8x17xf32>
    %80 = vector.extract_strided_slice %78 {offsets = [0, 0], sizes = [8, 495], strides = [1, 1]} : vector<8x512xf32> to vector<8x495xf32>
    %81 = tpu.concatenate %79, %80 in 1 : vector<8x17xf32>, vector<8x495xf32> -> vector<8x512xf32>
    %82 = vector.extract_strided_slice %1 {offsets = [0, 0, 0], sizes = [1, 1, 512], strides = [1, 1, 1]} : vector<9x1x512xf32> to vector<1x1x512xf32>
    %83 = vector.shape_cast %82 : vector<1x1x512xf32> to vector<1x512xf32>
    %84 = vector.broadcast %83 : vector<1x512xf32> to vector<8x512xf32>
    %85 = arith.mulf %81, %84 : vector<8x512xf32>
    %c0_30 = arith.constant 0 : index
    %c0_31 = arith.constant 0 : index
    %86 = vector.load %arg8[%c0_30, %c0_31] : memref<72x512xf32, #tpu.memory_space<vmem>>, vector<8x512xf32>
    tpu.vector_store %arg8[%c0_30, %c0_31], %85 {strides = array<i32>} : memref<72x512xf32, #tpu.memory_space<vmem>>, vector<8x512xf32>,
    %cst_32 = arith.constant 0.000000e+00 : f32
    %87 = vector.broadcast %cst_32 : f32 to vector<8x16xf32>
    %88 = vector.extract_strided_slice %78 {offsets = [0, 0], sizes = [8, 496], strides = [1, 1]} : vector<8x512xf32> to vector<8x496xf32>
    %89 = tpu.concatenate %87, %88 in 1 : vector<8x16xf32>, vector<8x496xf32> -> vector<8x512xf32>
    %90 = vector.extract_strided_slice %1 {offsets = [1, 0, 0], sizes = [1, 1, 512], strides = [1, 1, 1]} : vector<9x1x512xf32> to vector<1x1x512xf32>
    %91 = vector.shape_cast %90 : vector<1x1x512xf32> to vector<1x512xf32>
    %92 = vector.broadcast %91 : vector<1x512xf32> to vector<8x512xf32>
    %93 = arith.mulf %89, %92 : vector<8x512xf32>
    %c8_33 = arith.constant 8 : index
    %c0_34 = arith.constant 0 : index
    %94 = vector.load %arg8[%c8_33, %c0_34] : memref<72x512xf32, #tpu.memory_space<vmem>>, vector<8x512xf32>
    tpu.vector_store %arg8[%c8_33, %c0_34], %93 {strides = array<i32>} : memref<72x512xf32, #tpu.memory_space<vmem>>, vector<8x512xf32>,
    %cst_35 = arith.constant 0.000000e+00 : f32
    %95 = vector.broadcast %cst_35 : f32 to vector<8x15xf32>
    %96 = vector.extract_strided_slice %78 {offsets = [0, 0], sizes = [8, 497], strides = [1, 1]} : vector<8x512xf32> to vector<8x497xf32>
    %97 = tpu.concatenate %95, %96 in 1 : vector<8x15xf32>, vector<8x497xf32> -> vector<8x512xf32>
    %98 = vector.extract_strided_slice %1 {offsets = [2, 0, 0], sizes = [1, 1, 512], strides = [1, 1, 1]} : vector<9x1x512xf32> to vector<1x1x512xf32>
    %99 = vector.shape_cast %98 : vector<1x1x512xf32> to vector<1x512xf32>
    %100 = vector.broadcast %99 : vector<1x512xf32> to vector<8x512xf32>
    %101 = arith.mulf %97, %100 : vector<8x512xf32>
    %c16_36 = arith.constant 16 : index
    %c0_37 = arith.constant 0 : index
    %102 = vector.load %arg8[%c16_36, %c0_37] : memref<72x512xf32, #tpu.memory_space<vmem>>, vector<8x512xf32>
    tpu.vector_store %arg8[%c16_36, %c0_37], %101 {strides = array<i32>} : memref<72x512xf32, #tpu.memory_space<vmem>>, vector<8x512xf32>,
    %cst_38 = arith.constant 0.000000e+00 : f32
    %103 = vector.broadcast %cst_38 : f32 to vector<8x1xf32>
    %104 = vector.extract_strided_slice %78 {offsets = [0, 0], sizes = [8, 511], strides = [1, 1]} : vector<8x512xf32> to vector<8x511xf32>
    %105 = tpu.concatenate %103, %104 in 1 : vector<8x1xf32>, vector<8x511xf32> -> vector<8x512xf32>
    %106 = vector.extract_strided_slice %1 {offsets = [3, 0, 0], sizes = [1, 1, 512], strides = [1, 1, 1]} : vector<9x1x512xf32> to vector<1x1x512xf32>
    %107 = vector.shape_cast %106 : vector<1x1x512xf32> to vector<1x512xf32>
    %108 = vector.broadcast %107 : vector<1x512xf32> to vector<8x512xf32>
    %109 = arith.mulf %105, %108 : vector<8x512xf32>
    %c24_39 = arith.constant 24 : index
    %c0_40 = arith.constant 0 : index
    %110 = vector.load %arg8[%c24_39, %c0_40] : memref<72x512xf32, #tpu.memory_space<vmem>>, vector<8x512xf32>
    tpu.vector_store %arg8[%c24_39, %c0_40], %109 {strides = array<i32>} : memref<72x512xf32, #tpu.memory_space<vmem>>, vector<8x512xf32>,
    %111 = vector.extract_strided_slice %1 {offsets = [4, 0, 0], sizes = [1, 1, 512], strides = [1, 1, 1]} : vector<9x1x512xf32> to vector<1x1x512xf32>
    %112 = vector.shape_cast %111 : vector<1x1x512xf32> to vector<1x512xf32>
    %113 = vector.broadcast %112 : vector<1x512xf32> to vector<8x512xf32>
    %114 = arith.mulf %78, %113 : vector<8x512xf32>
    %c32_41 = arith.constant 32 : index
    %c0_42 = arith.constant 0 : index
    %115 = vector.load %arg8[%c32_41, %c0_42] : memref<72x512xf32, #tpu.memory_space<vmem>>, vector<8x512xf32>
    tpu.vector_store %arg8[%c32_41, %c0_42], %114 {strides = array<i32>} : memref<72x512xf32, #tpu.memory_space<vmem>>, vector<8x512xf32>,
    %cst_43 = arith.constant 0.000000e+00 : f32
    %116 = vector.broadcast %cst_43 : f32 to vector<8x1xf32>
    %117 = vector.extract_strided_slice %78 {offsets = [0, 1], sizes = [8, 511], strides = [1, 1]} : vector<8x512xf32> to vector<8x511xf32>
    %118 = tpu.concatenate %117, %116 in 1 : vector<8x511xf32>, vector<8x1xf32> -> vector<8x512xf32>
    %119 = vector.extract_strided_slice %1 {offsets = [5, 0, 0], sizes = [1, 1, 512], strides = [1, 1, 1]} : vector<9x1x512xf32> to vector<1x1x512xf32>
    %120 = vector.shape_cast %119 : vector<1x1x512xf32> to vector<1x512xf32>
    %121 = vector.broadcast %120 : vector<1x512xf32> to vector<8x512xf32>
    %122 = arith.mulf %118, %121 : vector<8x512xf32>
    %c40_44 = arith.constant 40 : index
    %c0_45 = arith.constant 0 : index
    %123 = vector.load %arg8[%c40_44, %c0_45] : memref<72x512xf32, #tpu.memory_space<vmem>>, vector<8x512xf32>
    tpu.vector_store %arg8[%c40_44, %c0_45], %122 {strides = array<i32>} : memref<72x512xf32, #tpu.memory_space<vmem>>, vector<8x512xf32>,
    %cst_46 = arith.constant 0.000000e+00 : f32
    %124 = vector.broadcast %cst_46 : f32 to vector<8x15xf32>
    %125 = vector.extract_strided_slice %78 {offsets = [0, 15], sizes = [8, 497], strides = [1, 1]} : vector<8x512xf32> to vector<8x497xf32>
    %126 = tpu.concatenate %125, %124 in 1 : vector<8x497xf32>, vector<8x15xf32> -> vector<8x512xf32>
    %127 = vector.extract_strided_slice %1 {offsets = [6, 0, 0], sizes = [1, 1, 512], strides = [1, 1, 1]} : vector<9x1x512xf32> to vector<1x1x512xf32>
    %128 = vector.shape_cast %127 : vector<1x1x512xf32> to vector<1x512xf32>
    %129 = vector.broadcast %128 : vector<1x512xf32> to vector<8x512xf32>
    %130 = arith.mulf %126, %129 : vector<8x512xf32>
    %c48_47 = arith.constant 48 : index
    %c0_48 = arith.constant 0 : index
    %131 = vector.load %arg8[%c48_47, %c0_48] : memref<72x512xf32, #tpu.memory_space<vmem>>, vector<8x512xf32>
    tpu.vector_store %arg8[%c48_47, %c0_48], %130 {strides = array<i32>} : memref<72x512xf32, #tpu.memory_space<vmem>>, vector<8x512xf32>,
    %cst_49 = arith.constant 0.000000e+00 : f32
    %132 = vector.broadcast %cst_49 : f32 to vector<8x16xf32>
    %133 = vector.extract_strided_slice %78 {offsets = [0, 16], sizes = [8, 496], strides = [1, 1]} : vector<8x512xf32> to vector<8x496xf32>
    %134 = tpu.concatenate %133, %132 in 1 : vector<8x496xf32>, vector<8x16xf32> -> vector<8x512xf32>
    %135 = vector.extract_strided_slice %1 {offsets = [7, 0, 0], sizes = [1, 1, 512], strides = [1, 1, 1]} : vector<9x1x512xf32> to vector<1x1x512xf32>
    %136 = vector.shape_cast %135 : vector<1x1x512xf32> to vector<1x512xf32>
    %137 = vector.broadcast %136 : vector<1x512xf32> to vector<8x512xf32>
    %138 = arith.mulf %134, %137 : vector<8x512xf32>
    %c56_50 = arith.constant 56 : index
    %c0_51 = arith.constant 0 : index
    %139 = vector.load %arg8[%c56_50, %c0_51] : memref<72x512xf32, #tpu.memory_space<vmem>>, vector<8x512xf32>
    tpu.vector_store %arg8[%c56_50, %c0_51], %138 {strides = array<i32>} : memref<72x512xf32, #tpu.memory_space<vmem>>, vector<8x512xf32>,
    %cst_52 = arith.constant 0.000000e+00 : f32
    %140 = vector.broadcast %cst_52 : f32 to vector<8x17xf32>
    %141 = vector.extract_strided_slice %78 {offsets = [0, 17], sizes = [8, 495], strides = [1, 1]} : vector<8x512xf32> to vector<8x495xf32>
    %142 = tpu.concatenate %141, %140 in 1 : vector<8x495xf32>, vector<8x17xf32> -> vector<8x512xf32>
    %143 = vector.extract_strided_slice %1 {offsets = [8, 0, 0], sizes = [1, 1, 512], strides = [1, 1, 1]} : vector<9x1x512xf32> to vector<1x1x512xf32>
    %144 = vector.shape_cast %143 : vector<1x1x512xf32> to vector<1x512xf32>
    %145 = vector.broadcast %144 : vector<1x512xf32> to vector<8x512xf32>
    %146 = arith.mulf %142, %145 : vector<8x512xf32>
    %c64_53 = arith.constant 64 : index
    %c0_54 = arith.constant 0 : index
    %147 = vector.load %arg8[%c64_53, %c0_54] : memref<72x512xf32, #tpu.memory_space<vmem>>, vector<8x512xf32>
    tpu.vector_store %arg8[%c64_53, %c0_54], %146 {strides = array<i32>} : memref<72x512xf32, #tpu.memory_space<vmem>>, vector<8x512xf32>,
    %c0_55 = arith.constant 0 : index
    %c0_56 = arith.constant 0 : index
    %148 = vector.load %arg4[%c0_55, %c0_56] : memref<8x72xf32, #tpu.memory_space<vmem>>, vector<8x72xf32>
    %c0_57 = arith.constant 0 : index
    %c0_58 = arith.constant 0 : index
    %149 = vector.load %arg8[%c0_57, %c0_58] : memref<72x512xf32, #tpu.memory_space<vmem>>, vector<72x512xf32>
    %cst_59 = arith.constant dense<0.000000e+00> : vector<8x512xf32>
    %150 = tpu.matmul %148, %149, %cst_59 {dimension_numbers = #tpu.dot_dimension_numbers<[1], [0], [0], [1], [0, 0, 1, 1], [], []>} : vector<8x72xf32>, vector<72x512xf32>, vector<8x512xf32> -> vector<8x512xf32>
    %c0_60 = arith.constant 0 : index
    %c0_61 = arith.constant 0 : index
    %151 = vector.load %arg5[%c0_60, %c0_61] : memref<8x1xf32, #tpu.memory_space<vmem>>, vector<8x1xf32>
    %152 = vector.broadcast %151 : vector<8x1xf32> to vector<8x512xf32>
    %153 = arith.addf %150, %152 : vector<8x512xf32>
    %154 = arith.addf %153, %0 : vector<8x512xf32>
    %cst_62 = arith.constant 0.000000e+00 : f32
    %155 = vector.broadcast %cst_62 : f32 to vector<8x512xf32>
    %156 = arith.maximumf %154, %155 : vector<8x512xf32>
    %c0_63 = arith.constant 0 : index
    %c0_64 = arith.constant 0 : index
    %157 = vector.load %arg7[%c0_63, %c0_64] : memref<8x512xf32, #tpu.memory_space<vmem>>, vector<8x512xf32>
    tpu.vector_store %arg7[%c0_63, %c0_64], %156 {strides = array<i32>} : memref<8x512xf32, #tpu.memory_space<vmem>>, vector<8x512xf32>,
    return
  }
  func.func @transform_0(%arg0: i32) -> (i32, i32) {
    %c0_i32 = arith.constant 0 : i32
    %c0_i32_0 = arith.constant 0 : i32
    %c0_i32_1 = arith.constant 0 : i32
    return %c0_i32, %c0_i32_0 : i32, i32
  }
  func.func @transform_1(%arg0: i32) -> (i32, i32) {
    %c0_i32 = arith.constant 0 : i32
    %c0_i32_0 = arith.constant 0 : i32
    %c0_i32_1 = arith.constant 0 : i32
    return %c0_i32, %c0_i32_0 : i32, i32
  }
  func.func @transform_2(%arg0: i32) -> (i32, i32) {
    %c0_i32 = arith.constant 0 : i32
    %c0_i32_0 = arith.constant 0 : i32
    %c0_i32_1 = arith.constant 0 : i32
    return %c0_i32, %c0_i32_0 : i32, i32
  }
  func.func @transform_3(%arg0: i32) -> (i32, i32) {
    %c0_i32 = arith.constant 0 : i32
    %c0_i32_0 = arith.constant 0 : i32
    %c0_i32_1 = arith.constant 0 : i32
    return %c0_i32, %c0_i32_0 : i32, i32
  }
  func.func @transform_4(%arg0: i32) -> (i32, i32) {
    %c0_i32 = arith.constant 0 : i32
    %c0_i32_0 = arith.constant 0 : i32
    %c0_i32_1 = arith.constant 0 : i32
    return %c0_i32, %c0_i32_0 : i32, i32
  }
  func.func @transform_5(%arg0: i32) -> (i32, i32, i32) {
    %c0_i32 = arith.constant 0 : i32
    %c0_i32_0 = arith.constant 0 : i32
    %c0_i32_1 = arith.constant 0 : i32
    %c0_i32_2 = arith.constant 0 : i32
    return %c0_i32, %c0_i32_0, %c0_i32_1 : i32, i32, i32
  }
  func.func @transform_6(%arg0: i32) -> (i32, i32) {
    %c0_i32 = arith.constant 0 : i32
    %c0_i32_0 = arith.constant 0 : i32
    %c0_i32_1 = arith.constant 0 : i32
    return %c0_i32, %c0_i32_0 : i32, i32
  }
}

</mosaic_0001>

<bundles_post_ra>
// kernel: tpu_custom_call.1
= control target key start
LH: loop header
LB: loop body
LE: loop exit
PB: predicated region body
PF: predicated region fallthrough
CT: control target
= control target key end

     0   :  { %11 = vsyncpa [#allocation4], 0  ;;  %s1503_s0 = inlined_call_operand.hbm [shape: f32[8,512], index: 0, kind: input, shape index: {}]   ;;  %s1504_s1 = inlined_call_operand.vmem [shape: f32[8,72], index: 1, kind: input, shape index: {}]   ;;  %s1505_s2 = inlined_call_operand.vmem [shape: f32[8,1], index: 2, kind: input, shape index: {}]   ;;  %s1506_s3 = inlined_call_operand.vmem [shape: f32[8,72], index: 3, kind: input, shape index: {}]   ;;  %s1507_s4 = inlined_call_operand.vmem [shape: f32[8,1], index: 4, kind: input, shape index: {}]   ;;  %s1508_s5 = inlined_call_operand.hbm [shape: f32[9,1,512], index: 5, kind: input, shape index: {}]   ;;  %s1509_s6 = inlined_call_operand.hbm [shape: f32[8,512], index: 6, kind: output, shape index: {}]  }
   0x1   :  { %12 = vsyncpa [#allocation7], 0 }
   0x2   :  { %13 = vsyncpa [#allocation5], 0  ;;  %s19_s23 = sshll.u32 %s1503_s0, 4  ;;  %s953_s24 = smov [#allocation3]   ;;  %s20_s23 = int_to_ptr.hbm [resolvable:$true] %s19_s23 }
   0x3   :  { %s21_s25 = sshll.u32 %s953_s24, 4  ;;  %s37_s28 = sshll.u32 %s1508_s5, 4  ;;  %s22_s25 = int_to_ptr.vmem [resolvable:$true] %s21_s25  ;;  %s38_s28 = int_to_ptr.hbm [resolvable:$true] %s37_s28 }
   0x4   :  { %24 = dma.hbm_to_vmem [thread:$0]  %s20_s23, 512, %s22_s25, [#allocation4]  }
   0x5   :  { %s954_s29 = smov [#allocation6]   ;;  %s955_s7 = smov 64  }
   0x6   :  { %s39_s30 = sshll.u32 %s954_s29, 4  ;;  %s956_s8 = smov 4   ;;  %s40_s30 = int_to_ptr.vmem [resolvable:$true] %s39_s30 }
   0x7   :  { %45 = dma.hbm_to_vmem [thread:$0]  %s38_s28, 576, %s40_s30, [#allocation7], %s955_s7, %s955_s7, %s956_s8  }
   0x8   :  { %947 = dma.done.wait [#allocation4], 512  }
   0x9   :  { %948 = vsyncadd [#allocation4], 4294966784 }
   0xa   :  { %949 = dma.done.wait [#allocation7], 576  }
   0xb   :  { %950 = vsyncadd [#allocation7], 4294966720  ;;  %v1008_v0 = vld [vmem:[#allocation3 + $0x10] sm:$0xff]  ;;  %s957_s0 = smov 113   ;;  %s958_s9 = smov 112   ;;  %v1016_v1 = vld [vmem:[#allocation3 + $0x18] sm:$0xff] }
   0xc   :  { %262 = vrot.lane.b32.xlu2 %v1008_v0, %s957_s0  ;;  %296 = vrot.lane.b32.xlu1 %v1008_v0, %s958_s9  ;;  %s959_s5 = smov 111   ;;  %v1024_v2 = vld [vmem:[#allocation3 + $0x8] sm:$0xff]  ;;  %s960_s10 = smov 127   ;;  %v1038_v3 = vld [vmem:[#allocation3] sm:$0xff]  ;;  %vm300_vm0 = vcmask 916480   ;;  %vm334_vm1 = vcmask 908288  }
   0xd   :  { %330 = vrot.lane.b32.xlu0 %v1008_v0, %s959_s5  ;;  %s961_s11 = smov 1   ;;  %s962_s12 = smov 15   ;;  %v1088_v9 = vld [vmem:[#allocation6 + $0x20] sm:$0xf]  ;;  %v1090_v10 = vld [vmem:[#allocation6 + $0x1c] sm:$0xf] }
   0xe   :  { %s963_s13 = smov 16   ;;  %s964_s14 = smov 17   ;;  %v346_v11 = vperm.slane %v1088_v9, 2  ;;  %v347_v12 = vperm.slane %v1088_v9, 3  ;;  %v313_v13 = vperm.slane %v1090_v10, 3  ;;  %vm266_vm2 = vcmask 924672  }
   0xf   :  { %v1095_v15 = vld [vmem:[#allocation6 + $0x18] sm:$0xf]  ;;  %v312_v19 = vperm.slane %v1090_v10, 2  ;;  %v1115_v29 = vld [vmem:[#allocation6 + $0x10] sm:$0xf]  ;;  %vm232_vm3 = vcmask 1039360  }
  0x10   :  { %v279_v20 = vperm.slane %v1095_v15, 3  ;;  %v278_v28 = vperm.slane %v1095_v15, 2  ;;  %v1119_v31 = vld [vmem:[#allocation6 + $0x14] sm:$0xf]  ;;  %v211_v35 = vperm.slane %v1115_v29, 3  ;;  %v210_v38 = vperm.slane %v1115_v29, 2 }
  0x11   :  { %v245_v34 = vperm.slane %v1119_v31, 3  ;;  %v244_v37 = vperm.slane %v1119_v31, 2  ;;  %v1146_v48 = vld [vmem:[#allocation6 + $0xc] sm:$0xf]  ;;  %vm181_vm4 = vcmask 7168   ;;  %vm147_vm5 = vcmask 121856  }
  0x12   :  { %v219_v44 = vmul.f32 %v211_v35, %v1016_v1  ;;  %v218_v47 = vmul.f32 %v210_v38, %v1008_v0  ;;  %v193_v49 = vperm.slane %v1146_v48, 2  ;;  %v194_v50 = vperm.slane %v1146_v48, 3  ;;  %v1157_v57 = vld [vmem:[#allocation6 + $0x8] sm:$0xf]  ;;  %s840_s23 = sshll.u32 %s1509_s6, 4  ;;  %s841_s23 = int_to_ptr.hbm [resolvable:$true] %s840_s23 }
  0x13   :  { %v159_v59 = vperm.slane %v1157_v57, 2  ;;  %v160_v60 = vperm.slane %v1157_v57, 3  ;;  %vm113_vm6 = vcmask 130048   ;;  %vm79_vm7 = vcmask 138240  }
  0x14   :  { %264 = vrot.lane.b32.xlu2 %v1016_v1, %s957_s0  ;;  %298 = vrot.lane.b32.xlu1 %v1016_v1, %s958_s9  ;;  %vm403_vm8 = vcmask 588800  }
  0x15   :  { %332 = vrot.lane.b32.xlu0 %v1016_v1, %s959_s5 }
  0x1c   :  { %230 = vrot.lane.b32.xlu1 %v1016_v1, %s960_s10  ;;  %175 = vrot.lane.b32.xlu2 %v1024_v2, %s961_s11 }
  0x1d   :  { %228 = vrot.lane.b32.xlu0 %v1008_v0, %s960_s10 }
  0x24   :  { %179 = vrot.lane.b32.xlu1 %v1016_v1, %s961_s11  ;;  %141 = vrot.lane.b32.xlu2 %v1024_v2, %s962_s12 }
  0x25   :  { %177 = vrot.lane.b32.xlu0 %v1008_v0, %s961_s11 }
  0x2c   :  { %145 = vrot.lane.b32.xlu1 %v1016_v1, %s962_s12  ;;  %326 = vrot.lane.b32.xlu2 %v1038_v3, %s959_s5 }
  0x2d   :  { %143 = vrot.lane.b32.xlu0 %v1008_v0, %s962_s12 }
  0x34   :  { %107 = vrot.lane.b32.xlu1 %v1024_v2, %s963_s13  ;;  %109 = vrot.lane.b32.xlu2 %v1008_v0, %s963_s13 }
  0x35   :  { %328 = vrot.lane.b32.xlu0 %v1024_v2, %s959_s5 }
  0x3c   :  { %292 = vrot.lane.b32.xlu1 %v1038_v3, %s958_s9  ;;  %294 = vrot.lane.b32.xlu2 %v1024_v2, %s958_s9 }
  0x3d   :  { %111 = vrot.lane.b32.xlu0 %v1016_v1, %s963_s13 }
  0x44   :  { %75 = vrot.lane.b32.xlu1 %v1008_v0, %s964_s14  ;;  %77 = vrot.lane.b32.xlu2 %v1016_v1, %s964_s14 }
  0x45   :  { %73 = vrot.lane.b32.xlu0 %v1024_v2, %s964_s14 }
  0x4c   :  { %260 = vrot.lane.b32.xlu1 %v1024_v2, %s957_s0  ;;  %224 = vrot.lane.b32.xlu2 %v1038_v3, %s960_s10 }
  0x4d   :  { %258 = vrot.lane.b32.xlu0 %v1038_v3, %s957_s0 }
  0x54   :  { %173 = vrot.lane.b32.xlu1 %v1038_v3, %s961_s11  ;;  %139 = vrot.lane.b32.xlu2 %v1038_v3, %s962_s12 }
  0x55   :  { %226 = vrot.lane.b32.xlu0 %v1024_v2, %s960_s10 }
  0x5c   :  { %71 = vrot.lane.b32.xlu1 %v1038_v3, %s964_s14 }
  0x5d   :  { %105 = vrot.lane.b32.xlu0 %v1038_v3, %s963_s13 }
  0x66   :  { %v1080_v4 = vpop.permute.xlu2 %262 }
  0x6e   :  { %v265_v5 = vpop.permute.xlu2 %264 }
  0x6f   :  { %v274_v21 = vsel %vm266_vm2, %v265_v5, 0.0  ;;  %v269_v30 = vsel %vm266_vm2, %v1080_v4, %v265_v5 }
  0x70   :  { %v287_v33 = vmul.f32 %v279_v20, %v274_v21  ;;  %v286_v36 = vmul.f32 %v278_v28, %v269_v30  ;;  %v311_v30 = vperm.slane %v1090_v10, 1 }
  0x76   :  { %v1082_v6 = vpop.permute.xlu2 %175 }
  0x7e   :  { %v1084_v7 = vpop.permute.xlu1 %296  ;;  %v1097_v16 = vpop.permute.xlu2 %141 }
  0x7f   :  { %v1086_v8 = vpop.permute.xlu0 %330 }
  0x86   :  { %v299_v14 = vpop.permute.xlu1 %298  ;;  %v327_v45 = vpop.permute.xlu2 %326 }
  0x87   :  { %v308_v17 = vsel %vm300_vm0, %v299_v14, 0.0  ;;  %v333_v18 = vpop.permute.xlu0 %332  ;;  %v303_v22 = vsel %vm300_vm0, %v1084_v7, %v299_v14 }
  0x88   :  { %v337_v23 = vsel %vm334_vm1, %v1086_v8, %v333_v18  ;;  %v342_v24 = vsel %vm334_vm1, %v333_v18, 0.0  ;;  %v321_v27 = vmul.f32 %v313_v13, %v308_v17  ;;  %v320_v32 = vmul.f32 %v312_v19, %v303_v22  ;;  %v1168_v18 = vld [vmem:[#allocation6 + $0x4] sm:$0xf] }
  0x89   :  { %v354_v25 = vmul.f32 %v346_v11, %v337_v23  ;;  %v355_v26 = vmul.f32 %v347_v12, %v342_v24  ;;  %v125_v21 = vperm.slane %v1168_v18, 2  ;;  %v344_v23 = vperm.slane %v1088_v9, 0 }
  0x8a   :  { %v345_v24 = vperm.slane %v1088_v9, 1 }
  0x8b   :  { %454 = vmatpush.msra.mxu2 %v354_v25  ;;  %474 = vmatpush.msra.mxu3 %v355_v26 }
  0x8d   :  { %455 = vmatpush.msra.mxu2 %v320_v32  ;;  %475 = vmatpush.msra.mxu3 %v321_v27 }
  0x8e   :  { %v231_v39 = vpop.permute.xlu1 %230  ;;  %v110_v58 = vpop.permute.xlu2 %109 }
  0x8f   :  { %v240_v40 = vsel %vm232_vm3, %v231_v39, 0.0  ;;  %456 = vmatpush.msra.mxu2 %v286_v36  ;;  %v1132_v41 = vpop.permute.xlu0 %228  ;;  %476 = vmatpush.msra.mxu3 %v287_v33 }
  0x90   :  { %v235_v42 = vsel %vm232_vm3, %v1132_v41, %v231_v39  ;;  %v253_v43 = vmul.f32 %v245_v34, %v240_v40 }
  0x91   :  { %v252_v46 = vmul.f32 %v244_v37, %v235_v42 }
  0x92   :  { %477 = vmatpush.msra.mxu3 %v253_v43  ;;  %v310_v43 = vperm.slane %v1090_v10, 0 }
  0x93   :  { %457 = vmatpush.msra.mxu2 %v252_v46 }
  0x94   :  { %478 = vmatpush.msra.mxu3 %v219_v44 }
  0x95   :  { %458 = vmatpush.msra.mxu2 %v218_v47 }
  0x96   :  { %v180_v51 = vpop.permute.xlu1 %179  ;;  %v295_v22 = vpop.permute.xlu2 %294 }
  0x97   :  { %v178_v52 = vpop.permute.xlu0 %177  ;;  %v302_v32 = vsel %vm300_vm0, %v295_v22, %v1084_v7 }
  0x98   :  { %v183_v53 = vsel %vm181_vm4, %v1082_v6, %v178_v52  ;;  %v184_v54 = vsel %vm181_vm4, %v178_v52, %v180_v51  ;;  %v319_v7 = vmul.f32 %v311_v30, %v302_v32  ;;  %v276_v32 = vperm.slane %v1095_v15, 0 }
  0x99   :  { %v201_v55 = vmul.f32 %v193_v49, %v183_v53  ;;  %v202_v56 = vmul.f32 %v194_v50, %v184_v54  ;;  %v1199_v53 = vld [vmem:[#allocation6] sm:$0xf] }
  0x9b   :  { %459 = vmatpush.msra.mxu2 %v201_v55  ;;  %479 = vmatpush.msra.mxu3 %v202_v56  ;;  %v92_v55 = vperm.slane %v1199_v53, 3  ;;  %v91_v56 = vperm.slane %v1199_v53, 2 }
  0x9e   :  { %v146_v61 = vpop.permute.xlu1 %145  ;;  %v78_v54 = vpop.permute.xlu2 %77 }
  0x9f   :  { %v144_v62 = vpop.permute.xlu0 %143 }
  0xa0   :  { %v149_v63 = vsel %vm147_vm5, %v1097_v16, %v144_v62  ;;  %v150_v5 = vsel %vm147_vm5, %v144_v62, %v146_v61 }
  0xa1   :  { %v167_v14 = vmul.f32 %v159_v59, %v149_v63  ;;  %v168_v17 = vmul.f32 %v160_v60, %v150_v5  ;;  %v965_v5 = vmov 0  }
  0xa2   :  { %873 = vset.pattern.permute.xlu2 %v965_v5  ;;  %874 = vset.pattern.permute.xlu0 %v965_v5 }
  0xa3   :  { %460 = vmatpush.msra.mxu2 %v167_v14  ;;  %480 = vmatpush.msra.mxu3 %v168_v17 }
  0xa6   :  { %v1173_v25 = vpop.permute.xlu1 %107 }
  0xa7   :  { %v115_v26 = vsel %vm113_vm6, %v1173_v25, %v110_v58  ;;  %v329_v27 = vpop.permute.xlu0 %328 }
  0xa8   :  { %v335_v33 = vsel %vm334_vm1, %v327_v45, %v329_v27  ;;  %v336_v36 = vsel %vm334_vm1, %v329_v27, %v1086_v8  ;;  %v133_v39 = vmul.f32 %v125_v21, %v115_v26  ;;  %v126_v8 = vperm.slane %v1168_v18, 3 }
  0xa9   :  { %v352_v40 = vmul.f32 %v344_v23, %v335_v33  ;;  %v353_v42 = vmul.f32 %v345_v24, %v336_v36  ;;  %v277_v27 = vperm.slane %v1095_v15, 1  ;;  %v225_v33 = vpop.permute.xlu2 %224 }
  0xaa   :  { %461 = vmatpush.msra.mxu2 %v133_v39 }
  0xab   :  { %414 = vmatpush.msra.mxu0 %v352_v40  ;;  %434 = vmatpush.msra.mxu1 %v353_v42 }
  0xad   :  { %435 = vmatpush.msra.mxu1 %v319_v7 }
  0xae   :  { %v293_v44 = vpop.permute.xlu1 %292 }
  0xaf   :  { %v112_v45 = vpop.permute.xlu0 %111  ;;  %v301_v46 = vsel %vm300_vm0, %v293_v44, %v295_v22  ;;  %v1216_v22 = vld [vmem:[%s1504_s1] sm:$0xff] }
  0xb0   :  { %v116_v47 = vsel %vm113_vm6, %v110_v58, %v112_v45  ;;  %v318_v51 = vmul.f32 %v310_v43, %v301_v46  ;;  %v397_v58 = vld [vmem:[%s1505_s2] sm:$0xff]  ;;  %v208_v45 = vperm.slane %v1115_v29, 0  ;;  %v242_v46 = vperm.slane %v1119_v31, 0 }
  0xb1   :  { %v134_v52 = vmul.f32 %v126_v8, %v116_v47  ;;  %400 = vperm.xlu2 %873, %v397_v58   ;;  %v243_v47 = vperm.slane %v1119_v31, 1  ;;  %v140_v58 = vpop.permute.xlu2 %139 }
  0xb2   :  { %415 = vmatpush.msra.mxu0 %v318_v51  ;;  %v209_v51 = vperm.slane %v1115_v29, 1 }
  0xb3   :  { %481 = vmatpush.msra.mxu3 %v134_v52 }
  0xb6   :  { %v76_v61 = vpop.permute.xlu1 %75 }
  0xb7   :  { %v1206_v62 = vpop.permute.xlu0 %73  ;;  %v82_v63 = vsel %vm79_vm7, %v76_v61, %v78_v54  ;;  %v191_v54 = vperm.slane %v1146_v48, 0 }
  0xb8   :  { %v81_v14 = vsel %vm79_vm7, %v1206_v62, %v76_v61  ;;  %v100_v17 = vmul.f32 %v92_v55, %v82_v63  ;;  %v192_v61 = vperm.slane %v1146_v48, 1 }
  0xb9   :  { %v99_v26 = vmul.f32 %v91_v56, %v81_v14  ;;  %v216_v14 = vmul.f32 %v208_v45, %v1038_v3 }
  0xba   :  { %482 = vmatpush.msra.mxu3 %v100_v17  ;;  %v157_v17 = vperm.slane %v1157_v57, 0 }
  0xbb   :  { %462 = vmatpush.msra.mxu2 %v99_v26  ;;  %854 = vmatmul.msk.f32.vlgmr.msra.gmra.mxu3 %vm403_vm8, %v1216_v22  ;;  %v155_v26 = vsel %vm147_vm5, 0.0, %v140_v58 }
  0xbc   :  { %853 = vmatmul.msk.f32.vlgmr.msra.gmra.mxu2 %vm403_vm8, %v1216_v22 }
  0xbe   :  { %v261_v36 = vpop.permute.xlu1 %260 }
  0xbf   :  { %v259_v39 = vpop.permute.xlu0 %258  ;;  %v268_v40 = vsel %vm266_vm2, %v261_v36, %v1080_v4 }
  0xc0   :  { %v267_v42 = vsel %vm266_vm2, %v259_v39, %v261_v36  ;;  %v285_v7 = vmul.f32 %v277_v27, %v268_v40 }
  0xc1   :  { %v284_v44 = vmul.f32 %v276_v32, %v267_v42  ;;  %v1514_v42 = vperm.slane %v1157_v57, 1 }
  0xc2   :  { %436 = vmatpush.msra.mxu1 %v285_v7  ;;  %v148_v7 = vsel %vm147_vm5, %v140_v58, %v1097_v16 }
  0xc3   :  { %416 = vmatpush.msra.mxu0 %v284_v44  ;;  %v165_v44 = vmul.f32 %v157_v17, %v155_v26  ;;  %v166_v58 = vmul.f32 %v1514_v42, %v148_v7 }
  0xc6   :  { %v174_v52 = vpop.permute.xlu1 %173 }
  0xc7   :  { %v227_v4 = vpop.permute.xlu0 %226  ;;  %v189_v40 = vsel %vm181_vm4, 0.0, %v174_v52 }
  0xc8   :  { %v233_v63 = vsel %vm232_vm3, %v225_v33, %v227_v4  ;;  %v234_v5 = vsel %vm232_vm3, %v227_v4, %v1132_v41  ;;  %v217_v33 = vmul.f32 %v209_v51, %v1024_v2  ;;  %v182_v41 = vsel %vm181_vm4, %v174_v52, %v1082_v6 }
  0xc9   :  { %v250_v36 = vmul.f32 %v242_v46, %v233_v63  ;;  %v251_v39 = vmul.f32 %v243_v47, %v234_v5  ;;  %v1513_v4 = vperm.slane %v1168_v18, 0  ;;  %v199_v63 = vmul.f32 %v191_v54, %v189_v40 }
  0xca   :  { %v200_v6 = vmul.f32 %v192_v61, %v182_v41  ;;  %v1512_v52 = vperm.slane %v1168_v18, 1  ;;  %v1511_v5 = vperm.slane %v1199_v53, 0 }
  0xcb   :  { %417 = vmatpush.msra.mxu0 %v250_v36  ;;  %437 = vmatpush.msra.mxu1 %v251_v39 }
  0xcd   :  { %418 = vmatpush.msra.mxu0 %v216_v14  ;;  %438 = vmatpush.msra.mxu1 %v217_v33  ;;  %v1510_v14 = vperm.slane %v1199_v53, 1 }
  0xce   :  { %v72_v36 = vpop.permute.xlu1 %71 }
  0xcf   :  { %v106_v39 = vpop.permute.xlu0 %105  ;;  %v87_v16 = vsel %vm79_vm7, 0.0, %v72_v36  ;;  %419 = vmatpush.msra.mxu0 %v199_v63  ;;  %439 = vmatpush.msra.mxu1 %v200_v6  ;;  %v80_v41 = vsel %vm79_vm7, %v72_v36, %v1206_v62 }
  0xd0   :  { %v114_v26 = vsel %vm113_vm6, %v106_v39, %v1173_v25  ;;  %v121_v33 = vsel %vm113_vm6, 0.0, %v106_v39  ;;  %v97_v7 = vmul.f32 %v1511_v5, %v87_v16  ;;  %v98_v25 = vmul.f32 %v1510_v14, %v80_v41 }
  0xd1   :  { %420 = vmatpush.msra.mxu0 %v165_v44  ;;  %440 = vmatpush.msra.mxu1 %v166_v58  ;;  %v131_v40 = vmul.f32 %v1513_v4, %v121_v33  ;;  %v132_v63 = vmul.f32 %v1512_v52, %v114_v26 }
  0xd3   :  { %421 = vmatpush.msra.mxu0 %v131_v40  ;;  %441 = vmatpush.msra.mxu1 %v132_v63 }
  0xd5   :  { %422 = vmatpush.msra.mxu0 %v97_v7  ;;  %442 = vmatpush.msra.mxu1 %v98_v25  ;;  %v732_v7 = vld [vmem:[%s1507_s4] sm:$0xff] }
  0xd6   :  { %851 = vmatmul.msk.f32.vlgmr.msra.gmra.mxu0 %vm403_vm8, %v1216_v22  ;;  %852 = vmatmul.msk.f32.vlgmr.msra.gmra.mxu1 %vm403_vm8, %v1216_v22 }
 0x10b   :  { %v401_v62 = vpop.permute.xlu2 %400 }
 0x13e   :  { %v484_v26 = vpop.f32.mrf.mxu3 }
 0x13f   :  { %v464_v22 = vpop.f32.mrf.mxu2  ;;  %v485_v41 = vadd.f32 %v484_v26, %v401_v62 }
 0x140   :  { %v465_v33 = vadd.f32 %v464_v22, %v401_v62 }
 0x141   :  { %v1320_v63 = vmax.f32 %v485_v41, 0.0 }
 0x142   :  { %v1318_v40 = vmax.f32 %v465_v33, 0.0 }
 0x153   :  { %v444_v44 = vpop.f32.mrf.mxu1  ;;  %v424_v6 = vpop.f32.mrf.mxu0 }
 0x154   :  { %v445_v36 = vadd.f32 %v444_v44, %v401_v62  ;;  %v425_v39 = vadd.f32 %v424_v6, %v401_v62 }
 0x156   :  { %v1290_v58 = vmax.f32 %v445_v36, 0.0  ;;  %v1292_v16 = vmax.f32 %v425_v39, 0.0 }
 0x158   :  { %673 = vrot.lane.b32.xlu0 %v1290_v58, %s959_s5  ;;  %647 = vrot.lane.b32.xlu1 %v1292_v16, %s958_s9 }
 0x159   :  { %671 = vrot.lane.b32.xlu2 %v1292_v16, %s959_s5 }
 0x160   :  { %569 = vrot.lane.b32.xlu0 %v1290_v58, %s961_s11  ;;  %625 = vrot.lane.b32.xlu1 %v1290_v58, %s957_s0 }
 0x161   :  { %649 = vrot.lane.b32.xlu2 %v1290_v58, %s958_s9 }
 0x168   :  { %623 = vrot.lane.b32.xlu0 %v1292_v16, %s957_s0  ;;  %521 = vrot.lane.b32.xlu1 %v1290_v58, %s963_s13 }
 0x169   :  { %545 = vrot.lane.b32.xlu2 %v1290_v58, %s962_s12 }
 0x170   :  { %601 = vrot.lane.b32.xlu0 %v1290_v58, %s960_s10  ;;  %497 = vrot.lane.b32.xlu1 %v1290_v58, %s964_s14 }
 0x171   :  { %599 = vrot.lane.b32.xlu2 %v1292_v16, %s960_s10 }
 0x178   :  { %675 = vrot.lane.b32.xlu0 %v1318_v40, %s959_s5  ;;  %677 = vrot.lane.b32.xlu1 %v1320_v63, %s959_s5 }
 0x179   :  { %651 = vrot.lane.b32.xlu2 %v1318_v40, %s958_s9 }
 0x180   :  { %653 = vrot.lane.b32.xlu0 %v1320_v63, %s958_s9  ;;  %627 = vrot.lane.b32.xlu1 %v1318_v40, %s957_s0 }
 0x181   :  { %629 = vrot.lane.b32.xlu2 %v1320_v63, %s957_s0 }
 0x188   :  { %603 = vrot.lane.b32.xlu0 %v1318_v40, %s960_s10  ;;  %605 = vrot.lane.b32.xlu1 %v1320_v63, %s960_s10 }
 0x189   :  { %573 = vrot.lane.b32.xlu2 %v1320_v63, %s961_s11 }
 0x190   :  { %547 = vrot.lane.b32.xlu0 %v1318_v40, %s962_s12  ;;  %571 = vrot.lane.b32.xlu1 %v1318_v40, %s961_s11 }
 0x191   :  { %523 = vrot.lane.b32.xlu2 %v1318_v40, %s963_s13 }
 0x198   :  { %525 = vrot.lane.b32.xlu0 %v1320_v63, %s963_s13  ;;  %549 = vrot.lane.b32.xlu1 %v1320_v63, %s962_s12 }
 0x199   :  { %499 = vrot.lane.b32.xlu2 %v1318_v40, %s964_s14 }
 0x1a0   :  { %501 = vrot.lane.b32.xlu0 %v1320_v63, %s964_s14  ;;  %567 = vrot.lane.b32.xlu1 %v1292_v16, %s961_s11 }
 0x1a1   :  { %543 = vrot.lane.b32.xlu2 %v1292_v16, %s962_s12 }
 0x1a8   :  { %519 = vrot.lane.b32.xlu0 %v1292_v16, %s963_s13  ;;  %495 = vrot.lane.b32.xlu1 %v1292_v16, %s964_s14 }
 0x1a9   :  { %735 = vperm.xlu2 %873, %v732_v7  }
 0x1b3   :  { %v672_v25 = vpop.permute.xlu2 %671 }
 0x1bb   :  { %v650_v62 = vpop.permute.xlu2 %649 }
 0x1c3   :  { %v1365_v44 = vpop.permute.xlu2 %545 }
 0x1ca   :  { %v674_v6 = vpop.permute.xlu0 %673  ;;  %v648_v36 = vpop.permute.xlu1 %647 }
 0x1cb   :  { %v679_v39 = vsel %vm334_vm1, %v672_v25, %v674_v6  ;;  %v655_v22 = vsel %vm300_vm0, %v648_v36, %v650_v62  ;;  %v600_v41 = vpop.permute.xlu2 %599 }
 0x1cc   :  { %v687_v26 = vmul.f32 %v679_v39, %v344_v23  ;;  %v663_v33 = vmul.f32 %v655_v22, %v310_v43 }
 0x1ce   :  { %748 = vmatpush.msrb.mxu0 %v687_v26 }
 0x1d0   :  { %749 = vmatpush.msrb.mxu0 %v663_v33  ;;  %v591_v33 = vmul.f32 %v1292_v16, %v208_v45 }
 0x1d2   :  { %v1373_v7 = vpop.permute.xlu0 %569  ;;  %v626_v14 = vpop.permute.xlu1 %625 }
 0x1d3   :  { %v652_v4 = vpop.permute.xlu2 %651 }
 0x1da   :  { %v624_v5 = vpop.permute.xlu0 %623  ;;  %v1375_v52 = vpop.permute.xlu1 %521 }
 0x1db   :  { %v631_v25 = vsel %vm266_vm2, %v624_v5, %v626_v14  ;;  %v630_v26 = vpop.permute.xlu2 %629 }
 0x1dc   :  { %v639_v36 = vmul.f32 %v631_v25, %v276_v32  ;;  %v656_v32 = vsel %vm300_vm0, %v650_v62, %v652_v4  ;;  %v638_v9 = vsel %vm266_vm2, %v630_v26, 0.0 }
 0x1dd   :  { %v664_v16 = vmul.f32 %v656_v32, %v311_v30 }
 0x1de   :  { %750 = vmatpush.msrb.mxu0 %v639_v36 }
 0x1e2   :  { %v602_v23 = vpop.permute.xlu0 %601  ;;  %v1380_v39 = vpop.permute.xlu1 %497 }
 0x1e3   :  { %v607_v43 = vsel %vm232_vm3, %v600_v41, %v602_v23  ;;  %v574_v62 = vpop.permute.xlu2 %573 }
 0x1e4   :  { %v615_v22 = vmul.f32 %v607_v43, %v242_v46 }
 0x1e6   :  { %751 = vmatpush.msrb.mxu0 %v615_v22 }
 0x1e8   :  { %752 = vmatpush.msrb.mxu0 %v591_v33 }
 0x1ea   :  { %v676_v5 = vpop.permute.xlu0 %675  ;;  %v678_v42 = vpop.permute.xlu1 %677 }
 0x1eb   :  { %v680_v25 = vsel %vm334_vm1, %v674_v6, %v676_v5  ;;  %v681_v36 = vsel %vm334_vm1, %v676_v5, %v678_v42  ;;  %v686_v41 = vsel %vm334_vm1, %v678_v42, 0.0 }
 0x1ec   :  { %v688_v46 = vmul.f32 %v680_v25, %v345_v24  ;;  %v689_v43 = vmul.f32 %v681_v36, %v346_v11  ;;  %v690_v45 = vmul.f32 %v686_v41, %v347_v12 }
 0x1ee   :  { %768 = vmatpush.msrb.mxu1 %v688_v46  ;;  %788 = vmatpush.msrb.mxu2 %v689_v43  ;;  %v695_v43 = vld [vmem:[%s1506_s3] sm:$0xff]  ;;  %s966_s3 = smov [#allocation8]  }
 0x1ef   :  { %808 = vmatpush.msrb.mxu3 %v690_v45  ;;  %s838_s20 = sshll.u32 %s966_s3, 4  ;;  %s839_s20 = int_to_ptr.vmem [resolvable:$true] %s838_s20 }
 0x1f0   :  { %769 = vmatpush.msrb.mxu1 %v664_v16 }
 0x1f2   :  { %v654_v6 = vpop.permute.xlu0 %653  ;;  %v628_v22 = vpop.permute.xlu1 %627 }
 0x1f3   :  { %v657_v42 = vsel %vm300_vm0, %v652_v4, %v654_v6  ;;  %v662_v24 = vsel %vm300_vm0, %v654_v6, 0.0  ;;  %v632_v33 = vsel %vm266_vm2, %v626_v14, %v628_v22  ;;  %v633_v11 = vsel %vm266_vm2, %v628_v22, %v630_v26  ;;  %v524_v26 = vpop.permute.xlu2 %523 }
 0x1f4   :  { %v640_v12 = vmul.f32 %v632_v33, %v277_v27  ;;  %v665_v30 = vmul.f32 %v657_v42, %v312_v19  ;;  %v666_v5 = vmul.f32 %v662_v24, %v313_v13  ;;  %v641_v4 = vmul.f32 %v633_v11, %v278_v28 }
 0x1f5   :  { %v642_v14 = vmul.f32 %v638_v9, %v279_v20  ;;  %v592_v20 = vmul.f32 %v1290_v58, %v209_v51 }
 0x1f6   :  { %770 = vmatpush.msrb.mxu1 %v640_v12  ;;  %789 = vmatpush.msrb.mxu2 %v665_v30 }
 0x1f7   :  { %809 = vmatpush.msrb.mxu3 %v666_v5  ;;  %v1516_v5 = vperm.slane %v1168_v18, 0 }
 0x1f8   :  { %790 = vmatpush.msrb.mxu2 %v641_v4  ;;  %v1517_v4 = vperm.slane %v1168_v18, 1 }
 0x1f9   :  { %810 = vmatpush.msrb.mxu3 %v642_v14 }
 0x1fa   :  { %v604_v32 = vpop.permute.xlu0 %603  ;;  %v606_v27 = vpop.permute.xlu1 %605 }
 0x1fb   :  { %v608_v25 = vsel %vm232_vm3, %v602_v23, %v604_v32  ;;  %v609_v19 = vsel %vm232_vm3, %v604_v32, %v606_v27  ;;  %v614_v10 = vsel %vm232_vm3, %v606_v27, 0.0  ;;  %v593_v23 = vmul.f32 %v1318_v40, %v210_v38  ;;  %v500_v36 = vpop.permute.xlu2 %499 }
 0x1fc   :  { %v616_v13 = vmul.f32 %v608_v25, %v243_v47  ;;  %v617_v28 = vmul.f32 %v609_v19, %v244_v37  ;;  %v618_v15 = vmul.f32 %v614_v10, %v245_v34  ;;  %v594_v47 = vmul.f32 %v1320_v63, %v211_v35 }
 0x1fd   :  { %v528_v35 = vsel %vm113_vm6, %v1375_v52, %v524_v26  ;;  %v504_v63 = vsel %vm79_vm7, %v1380_v39, %v500_v36 }
 0x1fe   :  { %771 = vmatpush.msrb.mxu1 %v616_v13  ;;  %791 = vmatpush.msrb.mxu2 %v617_v28  ;;  %v537_v41 = vmul.f32 %v528_v35, %v125_v21 }
 0x1ff   :  { %811 = vmatpush.msrb.mxu3 %v618_v15 }
 0x200   :  { %772 = vmatpush.msrb.mxu1 %v592_v20  ;;  %792 = vmatpush.msrb.mxu2 %v593_v23 }
 0x201   :  { %812 = vmatpush.msrb.mxu3 %v594_v47 }
 0x202   :  { %v548_v31 = vpop.permute.xlu0 %547  ;;  %v572_v34 = vpop.permute.xlu1 %571 }
 0x203   :  { %v552_v37 = vsel %vm147_vm5, %v1365_v44, %v548_v31  ;;  %v576_v51 = vsel %vm181_vm4, %v1373_v7, %v572_v34  ;;  %v577_v58 = vsel %vm181_vm4, %v572_v34, %v574_v62  ;;  %v544_v62 = vpop.permute.xlu2 %543 }
 0x204   :  { %v585_v38 = vmul.f32 %v576_v51, %v193_v49  ;;  %v586_v29 = vmul.f32 %v577_v58, %v194_v50  ;;  %v561_v40 = vmul.f32 %v552_v37, %v159_v59  ;;  %v513_v50 = vmul.f32 %v504_v63, %v91_v56 }
 0x205   :  { %v558_v22 = vsel %vm147_vm5, 0.0, %v544_v62 }
 0x206   :  { %793 = vmatpush.msrb.mxu2 %v585_v38  ;;  %813 = vmatpush.msrb.mxu3 %v586_v29  ;;  %v559_v12 = vmul.f32 %v558_v22, %v157_v17 }
 0x208   :  { %794 = vmatpush.msrb.mxu2 %v561_v40 }
 0x20a   :  { %v526_v46 = vpop.permute.xlu0 %525  ;;  %v550_v49 = vpop.permute.xlu1 %549  ;;  %795 = vmatpush.msrb.mxu2 %v537_v41 }
 0x20b   :  { %v529_v45 = vsel %vm113_vm6, %v524_v26, %v526_v46  ;;  %v553_v59 = vsel %vm147_vm5, %v548_v31, %v550_v49  ;;  %v1518_v26 = vperm.slane %v1199_v53, 0 }
 0x20c   :  { %796 = vmatpush.msrb.mxu2 %v513_v50  ;;  %v562_v16 = vmul.f32 %v553_v59, %v160_v60  ;;  %v538_v21 = vmul.f32 %v529_v45, %v126_v8  ;;  %v551_v60 = vsel %vm147_vm5, %v544_v62, %v1365_v44 }
 0x20d   :  { %857 = vmatmul.msk.f32.vlgmr.msrb.gmra.mxu2 %vm403_vm8, %v695_v43 }
 0x20e   :  { %814 = vmatpush.msrb.mxu3 %v562_v16 }
 0x210   :  { %815 = vmatpush.msrb.mxu3 %v538_v21 }
 0x212   :  { %v502_v56 = vpop.permute.xlu0 %501  ;;  %v568_v6 = vpop.permute.xlu1 %567 }
 0x213   :  { %v505_v42 = vsel %vm79_vm7, %v500_v36, %v502_v56  ;;  %v575_v24 = vsel %vm181_vm4, %v568_v6, %v1373_v7  ;;  %v582_v33 = vsel %vm181_vm4, 0.0, %v568_v6  ;;  %v1515_v7 = vperm.slane %v1157_v57, 1 }
 0x214   :  { %v583_v11 = vmul.f32 %v582_v33, %v191_v54  ;;  %v584_v8 = vmul.f32 %v575_v24, %v192_v61  ;;  %v514_v9 = vmul.f32 %v505_v42, %v92_v55 }
 0x215   :  { %v560_v30 = vmul.f32 %v551_v60, %v1515_v7 }
 0x216   :  { %753 = vmatpush.msrb.mxu0 %v583_v11  ;;  %773 = vmatpush.msrb.mxu1 %v584_v8 }
 0x217   :  { %816 = vmatpush.msrb.mxu3 %v514_v9 }
 0x218   :  { %858 = vmatmul.msk.f32.vlgmr.msrb.gmra.mxu3 %vm403_vm8, %v695_v43  ;;  %754 = vmatpush.msrb.mxu0 %v559_v12 }
 0x219   :  { %774 = vmatpush.msrb.mxu1 %v560_v30 }
 0x21a   :  { %v520_v54 = vpop.permute.xlu0 %519  ;;  %v496_v44 = vpop.permute.xlu1 %495 }
 0x21b   :  { %v527_v48 = vsel %vm113_vm6, %v520_v54, %v1375_v52  ;;  %v534_v55 = vsel %vm113_vm6, 0.0, %v520_v54  ;;  %v503_v61 = vsel %vm79_vm7, %v496_v44, %v1380_v39  ;;  %v510_v17 = vsel %vm79_vm7, 0.0, %v496_v44  ;;  %v736_v39 = vpop.permute.xlu2 %735 }
 0x21c   :  { %v535_v57 = vmul.f32 %v534_v55, %v1516_v5  ;;  %v536_v14 = vmul.f32 %v527_v48, %v1517_v4  ;;  %v511_v32 = vmul.f32 %v510_v17, %v1518_v26  ;;  %v1519_v52 = vperm.slane %v1199_v53, 1 }
 0x21e   :  { %755 = vmatpush.msrb.mxu0 %v535_v57  ;;  %775 = vmatpush.msrb.mxu1 %v536_v14  ;;  %v512_v27 = vmul.f32 %v503_v61, %v1519_v52 }
 0x220   :  { %756 = vmatpush.msrb.mxu0 %v511_v32  ;;  %776 = vmatpush.msrb.mxu1 %v512_v27 }
 0x221   :  { %855 = vmatmul.msk.f32.vlgmr.msrb.gmra.mxu0 %vm403_vm8, %v695_v43  ;;  %856 = vmatmul.msk.f32.vlgmr.msrb.gmra.mxu1 %vm403_vm8, %v695_v43 }
 0x290   :  { %v798_v25 = vpop.f32.mrf.mxu2 }
 0x291   :  { %v799_v19 = vadd.f32 %v798_v25, %v736_v39 }
 0x293   :  { %v823_v18 = vadd.f32 %v799_v19, %v1008_v0 }
 0x295   :  { %v827_v10 = vmax.f32 %v823_v18, 0.0 }
 0x297   :  { %831 = vst [vmem:[#allocation8 + $0x10] sm:$0xff] %v827_v10 }
 0x29b   :  { %v818_v13 = vpop.f32.mrf.mxu3 }
 0x29c   :  { %v819_v28 = vadd.f32 %v818_v13, %v736_v39 }
 0x29e   :  { %v824_v15 = vadd.f32 %v819_v28, %v1016_v1  ;;  %v758_v20 = vpop.f32.mrf.mxu0  ;;  %v778_v53 = vpop.f32.mrf.mxu1 }
 0x29f   :  { %v759_v23 = vadd.f32 %v758_v20, %v736_v39  ;;  %v779_v47 = vadd.f32 %v778_v53, %v736_v39 }
 0x2a0   :  { %v828_v31 = vmax.f32 %v824_v15, 0.0 }
 0x2a1   :  { %v821_v34 = vadd.f32 %v759_v23, %v1038_v3  ;;  %v822_v37 = vadd.f32 %v779_v47, %v1024_v2 }
 0x2a2   :  { %832 = vst [vmem:[#allocation8 + $0x18] sm:$0xff] %v828_v31 }
 0x2a3   :  { %v825_v0 = vmax.f32 %v821_v34, 0.0  ;;  %v826_v51 = vmax.f32 %v822_v37, 0.0 }
 0x2a5   :  { %829 = vst [vmem:[#allocation8] sm:$0xff] %v825_v0 }
 0x2a6   :  { %830 = vst [vmem:[#allocation8 + $0x8] sm:$0xff] %v826_v51 }
 0x2a7   :  { %843 = dma.vmem_to_hbm [thread:$0]  %s839_s20, 512, %s841_s23, [#allocation5]  }
 0x2a8   :  { %951 = dma.done.wait [#allocation5], 512  }
 0x2a9   :  { %952 = vsyncadd [#allocation5], 4294966784 }
 0x2aa   :  { %848 = vsyncpa [#allocation4], 1 }
 0x2ab   :  { %849 = vsyncpa [#allocation7], 1 }
 0x2ac   :  { %850 = vsyncpa [#allocation5], 1 }

</bundles_post_ra>
